<compile_context>
chip_gen: v7x
topology: tpu7x:2x2x1
jax: 0.10.0
libtpu: 0.0.40
codegen_flags: <defaults>
</compile_context>

<pallas_src>
import functools

import jax
import jax.numpy as jnp
from jax.experimental import pallas as pl
from jax.experimental.pallas import tpu as pltpu


# ----------------------------------------------------------------------------
# Kernels
# ----------------------------------------------------------------------------
def _norm_kernel_plain(x_ref, alpha_ref, bias_ref, o_ref, *, eps, d_model):
    """Normalization along the (lane) last axis; used when d_model is already
    lane-dense (>= 128 or not a clean divisor of 128)."""
    x = x_ref[...].astype(jnp.float32)                       # (TR, D)
    mean = jnp.mean(x, axis=-1, keepdims=True)               # (TR, 1)
    xc = x - mean
    # torch.std default is the unbiased estimator (ddof=1).  For d_model == 1
    # torch yields NaN; we guard and return bias instead (documented divergence).
    denom = max(d_model - 1, 1)
    var = jnp.sum(xc * xc, axis=-1, keepdims=True) * (1.0 / denom)
    std = jnp.sqrt(var)
    inv = pl.reciprocal(std + eps, approx=False)             # EUP, (TR, 1)
    out = (xc * inv) * alpha_ref[...] + bias_ref[...]
    o_ref[...] = out.astype(o_ref.dtype)


def _norm_kernel_packed(x_ref, alpha_ref, bias_ref, seg_ref, o_ref, *,
                        eps, d_model, split_lo):
    """Lane-packed variant: each 128-lane row holds p = 128 // d_model logical
    rows.  Per-segment sums are computed (and broadcast back) with one MXU
    matmul against a block-diagonal ones matrix."""
    x = x_ref[...].astype(jnp.float32)                       # (TR, 128)
    seg = seg_ref[...]                                       # (128, 128) bf16 block-diag ones

    def seg_sum(v):
        # bf16 hi/lo split recovers ~f32 accuracy for f32 inputs while keeping
        # the MXU operands plain bf16 (accumulation is f32).
        v_hi = v.astype(jnp.bfloat16)
        s = jnp.dot(v_hi, seg, preferred_element_type=jnp.float32)
        if split_lo:
            v_lo = (v - v_hi.astype(jnp.float32)).astype(jnp.bfloat16)
            s = s + jnp.dot(v_lo, seg, preferred_element_type=jnp.float32)
        return s                                              # (TR, 128)

    mean = seg_sum(x) * (1.0 / d_model)                       # broadcast per segment
    xc = x - mean
    var = seg_sum(xc * xc) * (1.0 / (d_model - 1))            # ddof=1 per logical row
    std = jnp.sqrt(var)
    inv = pl.reciprocal(std + eps, approx=False)              # EUP
    out = (xc * inv) * alpha_ref[...] + bias_ref[...]
    o_ref[...] = out.astype(o_ref.dtype)


# ----------------------------------------------------------------------------
# Tiling helpers
# ----------------------------------------------------------------------------
def _vmem_budget():
    """(target_block_bytes, vmem_limit_bytes) per TPU generation."""
    kind = ""
    try:
        kind = jax.devices()[0].device_kind.lower()
    except Exception:  # pragma: no cover - defensive
        pass
    if "v5" in kind or "v6" in kind:
        # 128 MiB physical VMEM: bigger blocks amortize the ~0.35us/step cost.
        return 8 * 1024 * 1024, 80 * 1024 * 1024
    # v7x (64 MiB physical VMEM) and unknown parts: stay conservative.
    return 4 * 1024 * 1024, 48 * 1024 * 1024


def _pick_row_tile(rows, width, itemsize, target_block_bytes):
    """Row tile for a (rows, width) array: sized by bytes, rounded down to the
    dtype's sublane tile, and split >= 2 ways when everything fits in one block
    so dimension_semantics=("parallel",) can shard across v7x's 2 TCs."""
    sub = max(8, 32 // max(itemsize, 1))          # 8 f32 / 16 bf16 / 32 int8
    tr = target_block_bytes // max(width * itemsize, 1)
    tr = max(sub, (tr // sub) * sub)
    if tr < rows:
        return tr
    if rows >= 2 * sub:                           # force at least a 2-step grid
        half = (rows + 1) // 2
        return ((half + sub - 1) // sub) * sub
    return rows                                   # tiny input: full-extent block


def _compiler_params(vmem_limit):
    return pltpu.CompilerParams(
        dimension_semantics=("parallel",),
        vmem_limit_bytes=vmem_limit,
    )


# ----------------------------------------------------------------------------
# Wrappers
# ----------------------------------------------------------------------------
def _norm_plain(x2, alpha, bias, eps, d_model, rows, itemsize,
                target_bytes, vmem_limit):
    alpha2 = alpha.reshape(1, d_model).astype(jnp.float32)
    bias2 = bias.reshape(1, d_model).astype(jnp.float32)

    tr = _pick_row_tile(rows, d_model, itemsize, target_bytes)
    grid = (pl.cdiv(rows, tr),)
    kernel = functools.partial(_norm_kernel_plain, eps=eps, d_model=d_model)

    cost = pl.CostEstimate(
        flops=8 * rows * d_model,
        transcendentals=2 * rows,
        bytes_accessed=2 * rows * d_model * itemsize + 8 * d_model,
    )

    return pl.pallas_call(
        kernel,
        out_shape=jax.ShapeDtypeStruct((rows, d_model), x2.dtype),
        grid_spec=pl.GridSpec(
            grid=grid,
            in_specs=[
                pl.BlockSpec((tr, d_model), lambda i: (i, 0)),
                pl.BlockSpec((1, d_model), lambda i: (0, 0)),   # alpha resident
                pl.BlockSpec((1, d_model), lambda i: (0, 0)),   # bias  resident
            ],
            out_specs=pl.BlockSpec((tr, d_model), lambda i: (i, 0)),
        ),
        compiler_params=_compiler_params(vmem_limit),
        cost_estimate=cost,
    )(x2, alpha2, bias2)


def _norm_packed(x2, alpha, bias, eps, d_model, rows, itemsize,
                 target_bytes, vmem_limit):
    p = 128 // d_model
    prows = (rows + p - 1) // p
    rows_pad = prows * p
    if rows_pad != rows:
        # Zero pad: padded logical rows produce `bias` (finite) and are sliced
        # off below; they never contaminate real rows (segmented math).
        x2 = jnp.pad(x2, ((0, rows_pad - rows), (0, 0)))
    xp = x2.reshape(prows, 128)                               # free contiguous reshape

    # alpha/bias tiled p times to match the packed lane layout.
    alpha_p = jnp.tile(alpha.reshape(1, d_model).astype(jnp.float32), (1, p))
    bias_p = jnp.tile(bias.reshape(1, d_model).astype(jnp.float32), (1, p))

    # 128x128 block-diagonal ones matrix: seg[i, j] = 1 iff lanes i, j belong
    # to the same d_model-wide segment (same logical row).
    lane_seg = jnp.arange(128, dtype=jnp.int32) // d_model
    seg = (lane_seg[:, None] == lane_seg[None, :]).astype(jnp.bfloat16)

    tr = _pick_row_tile(prows, 128, itemsize, target_bytes)
    grid = (pl.cdiv(prows, tr),)

    split_lo = x2.dtype != jnp.bfloat16          # bf16 input is already exact in bf16
    n_mm = 4 if split_lo else 2
    kernel = functools.partial(_norm_kernel_packed, eps=eps, d_model=d_model,
                               split_lo=split_lo)

    cost = pl.CostEstimate(
        flops=n_mm * 2 * prows * 128 * 128 + 8 * prows * 128,
        transcendentals=2 * prows * 128,
        bytes_accessed=2 * prows * 128 * itemsize + 128 * 128 * 2,
    )

    out = pl.pallas_call(
        kernel,
        out_shape=jax.ShapeDtypeStruct((prows, 128), x2.dtype),
        grid_spec=pl.GridSpec(
            grid=grid,
            in_specs=[
                pl.BlockSpec((tr, 128), lambda i: (i, 0)),
                pl.BlockSpec((1, 128), lambda i: (0, 0)),       # alpha resident
                pl.BlockSpec((1, 128), lambda i: (0, 0)),       # bias  resident
                pl.BlockSpec((128, 128), lambda i: (0, 0)),     # seg   resident
            ],
            out_specs=pl.BlockSpec((tr, 128), lambda i: (i, 0)),
        ),
        compiler_params=_compiler_params(vmem_limit),
        cost_estimate=cost,
    )(xp, alpha_p, bias_p, seg)

    return out.reshape(rows_pad, d_model)[:rows]


def norm_forward(x, alpha, bias, eps=1e-6):
    """Pallas implementation of `Norm.forward`.

    x:     (..., d_model)
    alpha: (d_model,)
    bias:  (d_model,)
    """
    orig_shape = x.shape
    d_model = int(orig_shape[-1])
    rows = 1
    for s in orig_shape[:-1]:
        rows *= int(s)

    x2 = x.reshape(rows, d_model)
    itemsize = jnp.dtype(x.dtype).itemsize
    target_bytes, vmem_limit = _vmem_budget()

    # Lane-pack small d_model (biggest measured lever: lane-dense DMAs/stores).
    pack = (1 < d_model < 128) and (128 % d_model == 0)
    # TODO(synk): d_model < 128 that does not divide 128 (e.g. 96) still takes
    # the plain (partially masked-store) path; a padded-segment packing could
    # cover it too.
    if pack:
        out = _norm_packed(x2, alpha, bias, eps, d_model, rows, itemsize,
                           target_bytes, vmem_limit)
    else:
        out = _norm_plain(x2, alpha, bias, eps, d_model, rows, itemsize,
                          target_bytes, vmem_limit)
    return out.reshape(orig_shape)


if __name__ == "__main__":
    key = jax.random.PRNGKey(0)
    batch, seq, d_model = 2, 8, 32

    x = jax.random.normal(key, (batch, seq, d_model), dtype=jnp.float32)
    # nn.Parameter(torch.ones/zeros(d_model)) equivalents.
    alpha = jnp.ones((d_model,), dtype=jnp.float32)
    bias = jnp.zeros((d_model,), dtype=jnp.float32)

    out = norm_forward(x, alpha, bias, eps=1e-6)
    out = jax.block_until_ready(out)

    # Reference in plain JAX (torch.std -> unbiased ddof=1; eps outside sqrt).
    mean = jnp.mean(x, axis=-1, keepdims=True)
    std = jnp.std(x, axis=-1, keepdims=True, ddof=1)
    ref = alpha * (x - mean) / (std + 1e-6) + bias
    assert jnp.allclose(out, ref, atol=1e-4, rtol=1e-4), "mismatch vs reference"

    print("KERNEL_OK")
</pallas_src>

<mosaic_0001>
module attributes {stable_mosaic.version = 11 : i64} {
  func.func @_norm_kernel_packed(%arg0: i32, %arg1: memref<4x128xf32, #tpu.memory_space<vmem>>, %arg2: memref<1x128xf32, #tpu.memory_space<vmem>>, %arg3: memref<1x128xf32, #tpu.memory_space<vmem>>, %arg4: memref<128x128xbf16, #tpu.memory_space<vmem>>, %arg5: memref<4x128xf32, #tpu.memory_space<vmem>>) attributes {dimension_semantics = [#tpu.dimension_semantics<parallel>], iteration_bounds = array<i64: 1>, scalar_prefetch = 0 : i64, scratch_operands = 0 : i64, tpu.core_type = #tpu.core_type<tc>, window_params = [{transform_indices = @transform_0, window_bounds = array<i64: 4, 128>}, {pipeline_mode = #tpu.pipeline_mode<synchronous>, transform_indices = @transform_1, window_bounds = array<i64: 1, 128>}, {pipeline_mode = #tpu.pipeline_mode<synchronous>, transform_indices = @transform_2, window_bounds = array<i64: 1, 128>}, {pipeline_mode = #tpu.pipeline_mode<synchronous>, transform_indices = @transform_3, window_bounds = array<i64: 128, 128>}, {transform_indices = @transform_4, window_bounds = array<i64: 4, 128>}]} {
    %c0 = arith.constant 0 : index
    %c0_0 = arith.constant 0 : index
    %0 = vector.load %arg1[%c0, %c0_0] : memref<4x128xf32, #tpu.memory_space<vmem>>, vector<4x128xf32>
    %c0_1 = arith.constant 0 : index
    %c0_2 = arith.constant 0 : index
    %1 = vector.load %arg4[%c0_1, %c0_2] : memref<128x128xbf16, #tpu.memory_space<vmem>>, vector<128x128xbf16>
    %2 = arith.truncf %0 : vector<4x128xf32> to vector<4x128xbf16>
    %cst = arith.constant dense<0.000000e+00> : vector<4x128xf32>
    %3 = tpu.matmul %2, %1, %cst {dimension_numbers = #tpu.dot_dimension_numbers<[1], [0], [0], [1], [0, 0, 1, 1], [], []>} : vector<4x128xbf16>, vector<128x128xbf16>, vector<4x128xf32> -> vector<4x128xf32>
    %4 = arith.extf %2 : vector<4x128xbf16> to vector<4x128xf32>
    %5 = arith.subf %0, %4 : vector<4x128xf32>
    %6 = arith.truncf %5 : vector<4x128xf32> to vector<4x128xbf16>
    %cst_3 = arith.constant dense<0.000000e+00> : vector<4x128xf32>
    %7 = tpu.matmul %6, %1, %cst_3 {dimension_numbers = #tpu.dot_dimension_numbers<[1], [0], [0], [1], [0, 0, 1, 1], [], []>} : vector<4x128xbf16>, vector<128x128xbf16>, vector<4x128xf32> -> vector<4x128xf32>
    %8 = arith.addf %3, %7 : vector<4x128xf32>
    %cst_4 = arith.constant 3.125000e-02 : f32
    %9 = vector.broadcast %cst_4 : f32 to vector<4x128xf32>
    %10 = arith.mulf %8, %9 : vector<4x128xf32>
    %11 = arith.subf %0, %10 : vector<4x128xf32>
    %12 = arith.mulf %11, %11 : vector<4x128xf32>
    %13 = arith.truncf %12 : vector<4x128xf32> to vector<4x128xbf16>
    %cst_5 = arith.constant dense<0.000000e+00> : vector<4x128xf32>
    %14 = tpu.matmul %13, %1, %cst_5 {dimension_numbers = #tpu.dot_dimension_numbers<[1], [0], [0], [1], [0, 0, 1, 1], [], []>} : vector<4x128xbf16>, vector<128x128xbf16>, vector<4x128xf32> -> vector<4x128xf32>
    %15 = arith.extf %13 : vector<4x128xbf16> to vector<4x128xf32>
    %16 = arith.subf %12, %15 : vector<4x128xf32>
    %17 = arith.truncf %16 : vector<4x128xf32> to vector<4x128xbf16>
    %cst_6 = arith.constant dense<0.000000e+00> : vector<4x128xf32>
    %18 = tpu.matmul %17, %1, %cst_6 {dimension_numbers = #tpu.dot_dimension_numbers<[1], [0], [0], [1], [0, 0, 1, 1], [], []>} : vector<4x128xbf16>, vector<128x128xbf16>, vector<4x128xf32> -> vector<4x128xf32>
    %19 = arith.addf %14, %18 : vector<4x128xf32>
    %cst_7 = arith.constant 0.0322580636 : f32
    %20 = vector.broadcast %cst_7 : f32 to vector<4x128xf32>
    %21 = arith.mulf %19, %20 : vector<4x128xf32>
    %22 = math.sqrt %21 : vector<4x128xf32>
    %cst_8 = arith.constant 9.99999997E-7 : f32
    %23 = vector.broadcast %cst_8 : f32 to vector<4x128xf32>
    %24 = arith.addf %22, %23 : vector<4x128xf32>
    %25 = tpu.reciprocal %24 : vector<4x128xf32> -> vector<4x128xf32>
    %26 = arith.mulf %11, %25 : vector<4x128xf32>
    %c0_9 = arith.constant 0 : index
    %c0_10 = arith.constant 0 : index
    %27 = vector.load %arg2[%c0_9, %c0_10] : memref<1x128xf32, #tpu.memory_space<vmem>>, vector<1x128xf32>
    %28 = vector.broadcast %27 : vector<1x128xf32> to vector<4x128xf32>
    %29 = arith.mulf %26, %28 : vector<4x128xf32>
    %c0_11 = arith.constant 0 : index
    %c0_12 = arith.constant 0 : index
    %30 = vector.load %arg3[%c0_11, %c0_12] : memref<1x128xf32, #tpu.memory_space<vmem>>, vector<1x128xf32>
    %31 = vector.broadcast %30 : vector<1x128xf32> to vector<4x128xf32>
    %32 = arith.addf %29, %31 : vector<4x128xf32>
    %c0_13 = arith.constant 0 : index
    %c0_14 = arith.constant 0 : index
    %33 = vector.load %arg5[%c0_13, %c0_14] : memref<4x128xf32, #tpu.memory_space<vmem>>, vector<4x128xf32>
    tpu.vector_store %arg5[%c0_13, %c0_14], %32 {strides = array<i32>} : memref<4x128xf32, #tpu.memory_space<vmem>>, vector<4x128xf32>,
    return
  }
  func.func @transform_0(%arg0: i32) -> (i32, i32) {
    %c0_i32 = arith.constant 0 : i32
    %c0_i32_0 = arith.constant 0 : i32
    return %arg0, %c0_i32 : i32, i32
  }
  func.func @transform_1(%arg0: i32) -> (i32, i32) {
    %c0_i32 = arith.constant 0 : i32
    %c0_i32_0 = arith.constant 0 : i32
    %c0_i32_1 = arith.constant 0 : i32
    return %c0_i32, %c0_i32_0 : i32, i32
  }
  func.func @transform_2(%arg0: i32) -> (i32, i32) {
    %c0_i32 = arith.constant 0 : i32
    %c0_i32_0 = arith.constant 0 : i32
    %c0_i32_1 = arith.constant 0 : i32
    return %c0_i32, %c0_i32_0 : i32, i32
  }
  func.func @transform_3(%arg0: i32) -> (i32, i32) {
    %c0_i32 = arith.constant 0 : i32
    %c0_i32_0 = arith.constant 0 : i32
    %c0_i32_1 = arith.constant 0 : i32
    return %c0_i32, %c0_i32_0 : i32, i32
  }
  func.func @transform_4(%arg0: i32) -> (i32, i32) {
    %c0_i32 = arith.constant 0 : i32
    %c0_i32_0 = arith.constant 0 : i32
    return %arg0, %c0_i32 : i32, i32
  }
}

</mosaic_0001>

<bundles_post_ra>
// kernel: tpu_custom_call.1
= control target key start
LH: loop header
LB: loop body
LE: loop exit
PB: predicated region body
PF: predicated region fallthrough
CT: control target
= control target key end

     0   :  { %9 = vsyncpa [#allocation3], 0  ;;  %s701_s0 = inlined_call_operand.hbm [shape: f32[4,128], index: 0, kind: input, shape index: {}]   ;;  %s702_s1 = inlined_call_operand.vmem [shape: f32[1,128], index: 1, kind: input, shape index: {}]   ;;  %s703_s2 = inlined_call_operand.vmem [shape: f32[1,128], index: 2, kind: input, shape index: {}]   ;;  %s704_s3 = inlined_call_operand.hbm [shape: bf16[128,128], index: 3, kind: input, shape index: {}]   ;;  %s705_s4 = inlined_call_operand.hbm [shape: f32[4,128], index: 4, kind: output, shape index: {}]  }
   0x1   :  { %10 = vsyncpa [#allocation6], 0 }
   0x2   :  { %11 = vsyncpa [#allocation4], 0  ;;  %s550_s15 = smov [#allocation2]   ;;  %s551_s17 = smov [#allocation5]  }
   0x3   :  { %s18_s16 = sshll.u32 %s550_s15, 4  ;;  %s31_s18 = sshll.u32 %s551_s17, 4  ;;  %s19_s16 = int_to_ptr.vmem [resolvable:$true] %s18_s16  ;;  %s582_s18 = int_to_ptr.vmem [resolvable:$true] %s31_s18 }
   0x4   :  { %s478_s21 = scalar_lea.hbm %s701_s0, 64 }
   0x5   :  { %p479_p0 = scmp.ne.s32.totalorder %s701_s0, %s478_s21  ;;  %p482_p1 = scmp.lt.u32.totalorder %s478_s21, %s701_s0 }
   0x7   :  { %p484_p2 = pnand %p482_p1, %p479_p0 }
   0x9   :  { %487 = shalt.err (!%p484_p2)
}
   0xa   :  { %s488_s26 = scalar_lea.vmem %s19_s16, 64  ;;  %p493_p4 = scmp.lt.s32.totalorder %s19_s16, %s19_s16 }
   0xb   :  { %p489_p3 = scmp.ne.s32.totalorder %s19_s16, %s488_s26  ;;  %p494_p5 = scmp.lt.s32.totalorder %s488_s26, %s488_s26 }
   0xd   :  { %p495_p6 = por %p494_p5, %p493_p4 }
   0xf   :  { %p496_p7 = pnand %p495_p6, %p489_p3 }
  0x11   :  { %499 = shalt.err (!%p496_p7)
}
  0x12   :  { %21 = dma.hbm_to_vmem [thread:$0]  %s701_s0, 64, %s19_s16, [#allocation3]  }
  0x13   :  { %s500_s5 = scalar_lea.hbm %s704_s3, 1024 }
  0x14   :  { %p501_p8 = scmp.ne.s32.totalorder %s704_s3, %s500_s5  ;;  %p504_p9 = scmp.lt.u32.totalorder %s500_s5, %s704_s3 }
  0x16   :  { %p506_p10 = pnand %p504_p9, %p501_p8 }
  0x18   :  { %509 = shalt.err (!%p506_p10)
}
  0x19   :  { %s510_s10 = scalar_lea.vmem %s582_s18, 1024  ;;  %p515_p12 = scmp.lt.s32.totalorder %s582_s18, %s582_s18 }
  0x1a   :  { %p511_p11 = scmp.ne.s32.totalorder %s582_s18, %s510_s10  ;;  %p516_p13 = scmp.lt.s32.totalorder %s510_s10, %s510_s10 }
  0x1c   :  { %p517_p0 = por %p516_p13, %p515_p12 }
  0x1e   :  { %p518_p1 = pnand %p517_p0, %p511_p11 }
  0x20   :  { %521 = shalt.err (!%p518_p1)
}
  0x21   :  { %s552_s0 = smov 64   ;;  %s553_s11 = smov 4  }
  0x22   :  { %37 = dma.hbm_to_vmem [thread:$0]  %s704_s3, 1024, %s582_s18, [#allocation6], %s552_s0, %s552_s0, %s553_s11  }
  0x23   :  { %544 = dma.done.wait [#allocation3], 64  }
  0x24   :  { %545 = vsyncadd [#allocation3], 4294967232 }
  0x25   :  { %546 = dma.done.wait [#allocation6], 1024  }
  0x26   :  { %547 = vsyncadd [#allocation6], 4294966272  ;;  %v554_v0 = vmov 0.0   ;;  %vm555_vm0 = vmmov 0   ;;  %v619_v1 = vld [vmem:[#allocation5] sm:$0xff]   ;;  %v622_v2 = vld [vmem:[#allocation5 + $0x8] sm:$0xff]  }
  0x27   :  { %371 = vmatprep.subr.bf16.mxu0 %v554_v0  ;;  %387 = vmatprep.mubr.msk.bf16.mxu0 %vm555_vm0, %v554_v0  ;;  %v628_v3 = vld [vmem:[#allocation5 + $0x10] sm:$0xff]   ;;  %v634_v4 = vld [vmem:[#allocation5 + $0x18] sm:$0xff]   ;;  %v640_v5 = vld [vmem:[#allocation5 + $0x20] sm:$0xff]   ;;  %s556_s17 = smov [#allocation7]  }
  0x28   :  { %411 = vmatprep.subr.bf16.mxu1 %v554_v0  ;;  %427 = vmatprep.mubr.msk.bf16.mxu1 %vm555_vm0, %v554_v0  ;;  %v45_v6 = vld [vmem:[#allocation2] sm:$0xf]  ;;  %v471_v8 = vld [vmem:[#allocation5 + $0x28] sm:$0xff]   ;;  %v472_v10 = vld [vmem:[#allocation5 + $0x30] sm:$0xff]   ;;  %s315_s18 = sshll.u32 %s556_s17, 4  ;;  %s316_s18 = int_to_ptr.vmem [resolvable:$true] %s315_s18 }
  0x29   :  { %372 = vmatpush3.bf16.msra.mxu0 %v619_v1  ;;  %412 = vmatpush3.bf16.msra.mxu1 %v619_v1  ;;  %v62_v7 = vpack.c.bf16 %v45_v6, %v45_v6  ;;  %v473_v12 = vld [vmem:[#allocation5 + $0x38] sm:$0xff]   ;;  %s522_s19 = scalar_lea.vmem %s316_s18, 64  ;;  %p527_p3 = scmp.lt.s32.totalorder %s316_s18, %s316_s18 }
  0x2a   :  { %373 = vmatprep.subr.bf16.mxu0 %v554_v0  ;;  %413 = vmatprep.subr.bf16.mxu1 %v554_v0  ;;  %v333_v37 = vld [vmem:[%s702_s1] ss:$0 sm:$0xff]  ;;  %p523_p2 = scmp.ne.s32.totalorder %s316_s18, %s522_s19  ;;  %p528_p4 = scmp.lt.s32.totalorder %s522_s19, %s522_s19 }
  0x2b   :  { %v63_v9 = vunpack.c.l.bf16 %v62_v7  ;;  %v334_v39 = vld [vmem:[%s703_s2] ss:$0 sm:$0xff] }
  0x2c   :  { %p529_p5 = por %p528_p4, %p527_p3 }
  0x2d   :  { %374 = vmatpush3.bf16.msra.mxu0 %v622_v2  ;;  %414 = vmatpush3.bf16.msra.mxu1 %v622_v2  ;;  %v64_v11 = vsub.f32 %v45_v6, %v63_v9 }
  0x2e   :  { %375 = vmatprep.subr.bf16.mxu0 %v554_v0  ;;  %415 = vmatprep.subr.bf16.mxu1 %v554_v0  ;;  %p530_p6 = pnand %p529_p5, %p523_p2 }
  0x2f   :  { %v65_v13 = vpack.c.bf16 %v64_v11, %v64_v11 }
  0x31   :  { %376 = vmatpush3.bf16.msra.mxu0 %v628_v3  ;;  %416 = vmatpush3.bf16.msra.mxu1 %v628_v3 }
  0x32   :  { %377 = vmatprep.subr.bf16.mxu0 %v554_v0  ;;  %417 = vmatprep.subr.bf16.mxu1 %v554_v0 }
  0x35   :  { %378 = vmatpush3.bf16.msra.mxu0 %v634_v4  ;;  %418 = vmatpush3.bf16.msra.mxu1 %v634_v4 }
  0x36   :  { %379 = vmatprep.subr.bf16.mxu0 %v554_v0  ;;  %419 = vmatprep.subr.bf16.mxu1 %v554_v0 }
  0x39   :  { %380 = vmatpush3.bf16.msra.mxu0 %v640_v5  ;;  %420 = vmatpush3.bf16.msra.mxu1 %v640_v5 }
  0x3a   :  { %381 = vmatprep.subr.bf16.mxu0 %v554_v0  ;;  %421 = vmatprep.subr.bf16.mxu1 %v554_v0 }
  0x3d   :  { %382 = vmatpush3.bf16.msra.mxu0 %v471_v8  ;;  %422 = vmatpush3.bf16.msra.mxu1 %v471_v8 }
  0x3e   :  { %383 = vmatprep.subr.bf16.mxu0 %v554_v0  ;;  %423 = vmatprep.subr.bf16.mxu1 %v554_v0 }
  0x41   :  { %384 = vmatpush3.bf16.msra.mxu0 %v472_v10  ;;  %424 = vmatpush3.bf16.msra.mxu1 %v472_v10 }
  0x42   :  { %385 = vmatprep.subr.bf16.mxu0 %v554_v0  ;;  %425 = vmatprep.subr.bf16.mxu1 %v554_v0 }
  0x45   :  { %386 = vmatpush3.bf16.msra.mxu0 %v473_v12  ;;  %426 = vmatpush3.bf16.msra.mxu1 %v473_v12 }
  0x46   :  { %391 = vmatprep.subr.bf16.mxu0 %v554_v0  ;;  %431 = vmatprep.subr.bf16.mxu1 %v554_v0 }
  0x48   :  { %388 = vmatmul.mubr.bf16.vlgmr.msra.gmra.mrb[0].mxu0 %v65_v13 }
  0x49   :  { %392 = vmatpush3.bf16.msra.mxu0 %v619_v1  ;;  %407 = vmatprep.mubr.msk.bf16.mxu0 %vm555_vm0, %v554_v0 }
  0x4a   :  { %393 = vmatprep.subr.bf16.mxu0 %v554_v0 }
  0x4d   :  { %394 = vmatpush3.bf16.msra.mxu0 %v622_v2 }
  0x4e   :  { %395 = vmatprep.subr.bf16.mxu0 %v554_v0 }
  0x51   :  { %396 = vmatpush3.bf16.msra.mxu0 %v628_v3 }
  0x52   :  { %397 = vmatprep.subr.bf16.mxu0 %v554_v0 }
  0x55   :  { %398 = vmatpush3.bf16.msra.mxu0 %v634_v4 }
  0x56   :  { %399 = vmatprep.subr.bf16.mxu0 %v554_v0 }
  0x59   :  { %400 = vmatpush3.bf16.msra.mxu0 %v640_v5 }
  0x5a   :  { %401 = vmatprep.subr.bf16.mxu0 %v554_v0 }
  0x5d   :  { %402 = vmatpush3.bf16.msra.mxu0 %v471_v8 }
  0x5e   :  { %403 = vmatprep.subr.bf16.mxu0 %v554_v0 }
  0x61   :  { %404 = vmatpush3.bf16.msra.mxu0 %v472_v10 }
  0x62   :  { %405 = vmatprep.subr.bf16.mxu0 %v554_v0 }
  0x65   :  { %406 = vmatpush3.bf16.msra.mxu0 %v473_v12 }
  0x68   :  { %408 = vmatmul.mubr.bf16.vlgmr.msra.gmra.mrb[0].mxu0 %v62_v7 }
 0x13b   :  { %v188_v14 = vpop.f32.mrb[0].mxu0 }
 0x13c   :  { %v194_v15 = vmul.f32 0.03125, %v188_v14  ;;  %v409_v16 = vpop.f32.mrb[1].mxu0 }
 0x13d   :  { %v191_v17 = vpop.f32.mrb[2].mxu0 }
 0x13e   :  { %v195_v18 = vsub.f32 %v45_v6, %v194_v15  ;;  %v410_v19 = vpop.f32.mrb[3].mxu0 }
 0x140   :  { %v196_v20 = vmul.f32 %v195_v18, %v195_v18 }
 0x142   :  { %v197_v21 = vpack.c.bf16 %v196_v20, %v196_v20 }
 0x144   :  { %v198_v22 = vunpack.c.l.bf16 %v197_v21 }
 0x146   :  { %v199_v23 = vsub.f32 %v196_v20, %v198_v22 }
 0x148   :  { %v200_v24 = vpack.c.bf16 %v199_v23, %v199_v23 }
 0x14a   :  { %428 = vmatmul.mubr.bf16.vlgmr.msra.gmra.mrb[0].mxu1 %v200_v24 }
 0x14b   :  { %432 = vmatpush3.bf16.msra.mxu1 %v619_v1  ;;  %447 = vmatprep.mubr.msk.bf16.mxu1 %vm555_vm0, %v554_v0 }
 0x14c   :  { %433 = vmatprep.subr.bf16.mxu1 %v554_v0 }
 0x14f   :  { %434 = vmatpush3.bf16.msra.mxu1 %v622_v2 }
 0x150   :  { %435 = vmatprep.subr.bf16.mxu1 %v554_v0 }
 0x153   :  { %436 = vmatpush3.bf16.msra.mxu1 %v628_v3 }
 0x154   :  { %437 = vmatprep.subr.bf16.mxu1 %v554_v0 }
 0x157   :  { %438 = vmatpush3.bf16.msra.mxu1 %v634_v4 }
 0x158   :  { %439 = vmatprep.subr.bf16.mxu1 %v554_v0 }
 0x15b   :  { %440 = vmatpush3.bf16.msra.mxu1 %v640_v5 }
 0x15c   :  { %441 = vmatprep.subr.bf16.mxu1 %v554_v0 }
 0x15f   :  { %442 = vmatpush3.bf16.msra.mxu1 %v471_v8 }
 0x160   :  { %443 = vmatprep.subr.bf16.mxu1 %v554_v0 }
 0x163   :  { %444 = vmatpush3.bf16.msra.mxu1 %v472_v10 }
 0x164   :  { %445 = vmatprep.subr.bf16.mxu1 %v554_v0 }
 0x167   :  { %446 = vmatpush3.bf16.msra.mxu1 %v473_v12 }
 0x16a   :  { %448 = vmatmul.mubr.bf16.vlgmr.msra.gmra.mrb[0].mxu1 %v197_v21 }
 0x23d   :  { %v275_v25 = vpop.f32.mrb[0].mxu1 }
 0x23e   :  { %v281_v26 = vmul.f32 0.032258064, %v275_v25  ;;  %v449_v27 = vpop.f32.mrb[1].mxu1 }
 0x23f   :  { %v278_v28 = vpop.f32.mrb[2].mxu1 }
 0x240   :  { %474 = vrsqrt.f32 %v281_v26  ;;  %v450_v29 = vpop.f32.mrb[3].mxu1  ;;  %vm284_vm1 = vcmp.eq.f32.partialorder %v281_v26, inf  ;;  %v287_v32 = vand.u32 2147483648, %v281_v26  ;;  %vm286_vm2 = vcmp.eq.f32.partialorder %v281_v26, 0.0 }
 0x24a   :  { %v475_v30 = vpop.eup %474 }
 0x24b   :  { %v283_v31 = vmul.f32 %v475_v30, %v281_v26 }
 0x24d   :  { %v285_v33 = vsel %vm284_vm1, %v281_v26, %v283_v31 }
 0x24e   :  { %v288_v34 = vsel %vm286_vm2, %v287_v32, %v285_v33 }
 0x24f   :  { %v289_v35 = vadd.f32 1e-06, %v288_v34 }
 0x251   :  { %476 = vrcp.f32 %v289_v35 }
 0x25b   :  { %v477_v36 = vpop.eup %476 }
 0x25c   :  { %v291_v38 = vmul.f32 %v477_v36, %v195_v18 }
 0x25e   :  { %v299_v40 = vmul.f32 %v333_v37, %v291_v38 }
 0x260   :  { %v307_v41 = vadd.f32 %v334_v39, %v299_v40 }
 0x262   :  { %308 = vst [vmem:[#allocation7] sm:$0xf] %v307_v41 }
 0x263   :  { %533 = shalt.err (!%p530_p6)
}
 0x264   :  { %s534_s21 = scalar_lea.hbm %s705_s4, 64 }
 0x265   :  { %p535_p7 = scmp.ne.s32.totalorder %s705_s4, %s534_s21  ;;  %p538_p8 = scmp.lt.u32.totalorder %s534_s21, %s705_s4 }
 0x267   :  { %p540_p9 = pnand %p538_p8, %p535_p7 }
 0x269   :  { %543 = shalt.err (!%p540_p9)
}
 0x26a   :  { %318 = dma.vmem_to_hbm [thread:$0]  %s316_s18, 64, %s705_s4, [#allocation4]  }
 0x26b   :  { %548 = dma.done.wait [#allocation4], 64  }
 0x26c   :  { %549 = vsyncadd [#allocation4], 4294967232 }
 0x26d   :  { %322 = vsyncpa [#allocation3], 1 }
 0x26e   :  { %323 = vsyncpa [#allocation6], 1 }
 0x26f   :  { %324 = vsyncpa [#allocation4], 1 }

</bundles_post_ra>
